<compile_context>
chip_gen: v7x
topology: tpu7x:2x2x1
jax: 0.10.0
libtpu: 0.0.40
codegen_flags: <defaults>
</compile_context>

<pallas_src>
import functools

import jax
import jax.numpy as jnp
from jax.experimental import pallas as pl
from jax.experimental.pallas import tpu as pltpu


def _vmem_limit_bytes():
    cap = 64 * 1024 * 1024
    try:
        cap = int(getattr(pltpu.get_tpu_info(), "vmem_capacity_bytes", cap))
    except Exception:
        pass
    return int(min(cap * 3 // 4, 48 * 1024 * 1024))


_VMEM_LIMIT = _vmem_limit_bytes()


# ---------------------------------------------------------------------------
# Kernels
# ---------------------------------------------------------------------------
def _ln_fused_kernel(x_ref, g_ref, b_ref, o_ref, *, inv_n, eps):
    """One sample per grid step; whole (C, HW) slab resident in VMEM."""
    x = x_ref[...].astype(jnp.float32)                       # (1, C, HW)
    s1 = jnp.sum(x, axis=(1, 2), keepdims=True)              # (1, 1, 1)
    s2 = jnp.sum(x * x, axis=(1, 2), keepdims=True)          # single pass
    mean = s1 * inv_n
    var = s2 * inv_n - mean * mean
    inv = jax.lax.rsqrt(var + eps)                           # EUP slot
    a = inv * g_ref[...]                                     # (1, C, 1)
    c = b_ref[...] - mean * a
    o_ref[...] = (x * a + c).astype(o_ref.dtype)


def _ln_stats_kernel(x_ref, s_ref, *, hw, t_hw):
    """Accumulate per-channel sum / sum-of-squares over lane (H*W) tiles."""
    @pl.when(pl.program_id(1) == 0)
    def _():
        s_ref[...] = jnp.zeros_like(s_ref)

    x = x_ref[...].astype(jnp.float32)                       # (1, C, t_hw)
    if hw % t_hw != 0:                                       # ragged last tile
        start = pl.program_id(1) * t_hw
        lane = jax.lax.broadcasted_iota(jnp.int32, x.shape, 2)
        x = jnp.where(start + lane < hw, x, 0.0)             # mask before use
    ps = jnp.sum(x, axis=2)                                  # (1, C)
    ps2 = jnp.sum(x * x, axis=2)                             # (1, C)
    s_ref[...] += jnp.stack([ps, ps2], axis=1)               # (1, 2, C)


def _ln_apply_kernel(x_ref, s_ref, g_ref, b_ref, o_ref, *, inv_n, eps):
    """Normalize a lane tile using the per-sample statistics."""
    s = s_ref[...]                                           # (1, 2, C)
    mean = jnp.sum(s[:, 0, :]) * inv_n                       # scalar
    msq = jnp.sum(s[:, 1, :]) * inv_n
    var = msq - mean * mean
    inv = jax.lax.rsqrt(var + eps)
    a = inv * g_ref[...]                                     # (1, C, 1)
    c = b_ref[...] - mean * a
    o_ref[...] = (x_ref[...].astype(jnp.float32) * a + c).astype(o_ref.dtype)


# ---------------------------------------------------------------------------
# Wrapper
# ---------------------------------------------------------------------------
def layer_norm(x_nchw, weight=None, bias=None, eps=1e-5, *,
               force_tiled=False, tile_cols=None,
               single_block_max_bytes=4 * 1024 * 1024):
    """DRIT++ LayerNorm forward.

    x_nchw : (B, C, H, W).  weight / bias : (C,) or (C,1,1); None == affine=False.
    Normalizes over (C,H,W) per sample; per-channel affine broadcast over H,W.
    """
    B, C, H, W = x_nchw.shape
    orig_dtype = x_nchw.dtype
    gamma = (jnp.ones((C,), jnp.float32) if weight is None
             else weight.reshape(C).astype(jnp.float32))
    beta = (jnp.zeros((C,), jnp.float32) if bias is None
            else bias.reshape(C).astype(jnp.float32))

    HW = H * W
    inv_n = 1.0 / float(C * HW)

    x = x_nchw.reshape(B, C, HW)           # free reshape: no transpose, no copy
    g = gamma.reshape(1, C, 1)
    b = beta.reshape(1, C, 1)

    sample_bytes = C * HW * x_nchw.dtype.itemsize
    use_tiled = force_tiled or sample_bytes > single_block_max_bytes
    t_hw = None
    if use_tiled:
        if tile_cols is not None:
            t_hw = int(tile_cols)
        else:
            t_hw = (2 * 1024 * 1024) // (C * 4)               # ~2 MiB per tile
        t_hw = max(128, (t_hw // 128) * 128)                  # lane-dense tiles
        if t_hw >= HW:
            use_tiled = False                                 # fused is cheaper

    if not use_tiled:
        out = pl.pallas_call(
            functools.partial(_ln_fused_kernel, inv_n=inv_n, eps=float(eps)),
            out_shape=jax.ShapeDtypeStruct((B, C, HW), orig_dtype),
            grid=(B,),
            in_specs=[pl.BlockSpec((1, C, HW), lambda i: (i, 0, 0)),
                      pl.BlockSpec((1, C, 1), lambda i: (0, 0, 0)),
                      pl.BlockSpec((1, C, 1), lambda i: (0, 0, 0))],
            out_specs=pl.BlockSpec((1, C, HW), lambda i: (i, 0, 0)),
            compiler_params=pltpu.CompilerParams(
                dimension_semantics=("parallel",),
                vmem_limit_bytes=_VMEM_LIMIT),
        )(x, g, b)
    else:
        T = pl.cdiv(HW, t_hw)
        # Pass 1: per-channel partial sums / sums-of-squares accumulated over
        # lane tiles (reduction axis last, "arbitrary"; output stays resident).
        stats = pl.pallas_call(
            functools.partial(_ln_stats_kernel, hw=HW, t_hw=t_hw),
            out_shape=jax.ShapeDtypeStruct((B, 2, C), jnp.float32),
            grid=(B, T),
            in_specs=[pl.BlockSpec((1, C, t_hw), lambda i, t: (i, 0, t))],
            out_specs=pl.BlockSpec((1, 2, C), lambda i, t: (i, 0, 0)),
            compiler_params=pltpu.CompilerParams(
                dimension_semantics=("parallel", "arbitrary"),
                vmem_limit_bytes=_VMEM_LIMIT),
        )(x)
        # Pass 2: normalize each lane tile with the per-sample stats.
        out = pl.pallas_call(
            functools.partial(_ln_apply_kernel, inv_n=inv_n, eps=float(eps)),
            out_shape=jax.ShapeDtypeStruct((B, C, HW), orig_dtype),
            grid=(B, T),
            in_specs=[pl.BlockSpec((1, C, t_hw), lambda i, t: (i, 0, t)),
                      pl.BlockSpec((1, 2, C), lambda i, t: (i, 0, 0)),
                      pl.BlockSpec((1, C, 1), lambda i, t: (0, 0, 0)),
                      pl.BlockSpec((1, C, 1), lambda i, t: (0, 0, 0))],
            out_specs=pl.BlockSpec((1, C, t_hw), lambda i, t: (i, 0, t)),
            compiler_params=pltpu.CompilerParams(
                dimension_semantics=("parallel", "parallel"),
                vmem_limit_bytes=_VMEM_LIMIT),
        )(x, stats, g, b)

    return out.reshape(B, C, H, W)


# ---------------------------------------------------------------------------
# Test
# ---------------------------------------------------------------------------
def _reference(x, w, b, eps=1e-5):
    mean = jnp.mean(x, axis=(1, 2, 3), keepdims=True)
    var = jnp.mean(jnp.square(x - mean), axis=(1, 2, 3), keepdims=True)
    xn = (x - mean) * jax.lax.rsqrt(var + eps)
    return xn * w.reshape(1, -1, 1, 1) + b.reshape(1, -1, 1, 1)


if __name__ == "__main__":
    key = jax.random.PRNGKey(0)
    kx, kw, kb, kx2, kx3 = jax.random.split(key, 5)

    # LayerNorm(n_out=64) as used after the second upsampling conv in DRIT++.
    B, C, H, W = 2, 64, 16, 16
    x = jax.random.normal(kx, (B, C, H, W), jnp.float32)
    weight = 1.0 + 0.1 * jax.random.normal(kw, (C, 1, 1), jnp.float32)
    bias = 0.1 * jax.random.normal(kb, (C, 1, 1), jnp.float32)

    fused = jax.jit(layer_norm)
    tiled = jax.jit(functools.partial(layer_norm, force_tiled=True, tile_cols=128))

    out = fused(x, weight, bias)
    out_tiled = tiled(x, weight, bias)      # exercises the two-stage reduction
    jax.block_until_ready((out, out_tiled))

    ref = _reference(x, weight, bias)
    assert out.shape == (B, C, H, W), out.shape
    assert bool(jnp.all(jnp.isfinite(out)))
    assert bool(jnp.allclose(out, ref, atol=2e-4, rtol=2e-4)), \
        float(jnp.max(jnp.abs(out - ref)))
    assert bool(jnp.allclose(out_tiled, ref, atol=2e-4, rtol=2e-4)), \
        float(jnp.max(jnp.abs(out_tiled - ref)))

    # Ragged lane tiling: H*W = 192 with 128-lane tiles -> masked last tile.
    x2 = jax.random.normal(kx2, (2, 64, 16, 12), jnp.float32)
    out2 = tiled(x2, weight, bias)
    jax.block_until_ready(out2)
    ref2 = _reference(x2, weight, bias)
    assert bool(jnp.allclose(out2, ref2, atol=2e-4, rtol=2e-4)), \
        float(jnp.max(jnp.abs(out2 - ref2)))

    # affine=False branch (F.layer_norm with no weight/bias) + narrow lanes.
    x3 = jax.random.normal(kx3, (2, 128, 8, 8), jnp.float32)
    out3 = fused(x3)
    jax.block_until_ready(out3)
    ref3 = _reference(x3, jnp.ones((128, 1, 1)), jnp.zeros((128, 1, 1)))
    assert bool(jnp.allclose(out3, ref3, atol=2e-4, rtol=2e-4)), \
        float(jnp.max(jnp.abs(out3 - ref3)))

    print("KERNEL_OK")
</pallas_src>

<mosaic_0001>
module attributes {stable_mosaic.version = 11 : i64} {
  func.func @_ln_fused_kernel(%arg0: i32, %arg1: memref<1x64x256xf32, #tpu.memory_space<vmem>>, %arg2: memref<1x64x1xf32, #tpu.memory_space<vmem>>, %arg3: memref<1x64x1xf32, #tpu.memory_space<vmem>>, %arg4: memref<1x64x256xf32, #tpu.memory_space<vmem>>) attributes {dimension_semantics = [#tpu.dimension_semantics<parallel>], iteration_bounds = array<i64: 2>, scalar_prefetch = 0 : i64, scratch_operands = 0 : i64, tpu.core_type = #tpu.core_type<tc>, window_params = [{transform_indices = @transform_0, window_bounds = array<i64: 1, 64, 256>}, {pipeline_mode = #tpu.pipeline_mode<synchronous>, transform_indices = @transform_1, window_bounds = array<i64: 1, 64, 1>}, {pipeline_mode = #tpu.pipeline_mode<synchronous>, transform_indices = @transform_2, window_bounds = array<i64: 1, 64, 1>}, {transform_indices = @transform_3, window_bounds = array<i64: 1, 64, 256>}]} {
    %c0 = arith.constant 0 : index
    %c0_0 = arith.constant 0 : index
    %c0_1 = arith.constant 0 : index
    %0 = vector.load %arg1[%c0, %c0_0, %c0_1] : memref<1x64x256xf32, #tpu.memory_space<vmem>>, vector<1x64x256xf32>
    %cst = arith.constant dense<0.000000e+00> : vector<1xf32>
    %1 = vector.multi_reduction <add>, %0, %cst [1, 2] : vector<1x64x256xf32> to vector<1xf32>
    %2 = vector.shape_cast %1 : vector<1xf32> to vector<1x1x1xf32>
    %3 = arith.mulf %0, %0 : vector<1x64x256xf32>
    %cst_2 = arith.constant dense<0.000000e+00> : vector<1xf32>
    %4 = vector.multi_reduction <add>, %3, %cst_2 [1, 2] : vector<1x64x256xf32> to vector<1xf32>
    %5 = vector.shape_cast %4 : vector<1xf32> to vector<1x1x1xf32>
    %cst_3 = arith.constant 6.10351563E-5 : f32
    %6 = vector.broadcast %cst_3 : f32 to vector<1x1x1xf32>
    %7 = arith.mulf %2, %6 : vector<1x1x1xf32>
    %cst_4 = arith.constant 6.10351563E-5 : f32
    %8 = vector.broadcast %cst_4 : f32 to vector<1x1x1xf32>
    %9 = arith.mulf %5, %8 : vector<1x1x1xf32>
    %10 = arith.mulf %7, %7 : vector<1x1x1xf32>
    %11 = arith.subf %9, %10 : vector<1x1x1xf32>
    %cst_5 = arith.constant 9.99999974E-6 : f32
    %12 = vector.broadcast %cst_5 : f32 to vector<1x1x1xf32>
    %13 = arith.addf %11, %12 : vector<1x1x1xf32>
    %14 = math.rsqrt %13 : vector<1x1x1xf32>
    %c0_6 = arith.constant 0 : index
    %c0_7 = arith.constant 0 : index
    %c0_8 = arith.constant 0 : index
    %15 = vector.load %arg2[%c0_6, %c0_7, %c0_8] : memref<1x64x1xf32, #tpu.memory_space<vmem>>, vector<1x64x1xf32>
    %16 = vector.broadcast %14 : vector<1x1x1xf32> to vector<1x64x1xf32>
    %17 = arith.mulf %16, %15 : vector<1x64x1xf32>
    %c0_9 = arith.constant 0 : index
    %c0_10 = arith.constant 0 : index
    %c0_11 = arith.constant 0 : index
    %18 = vector.load %arg3[%c0_9, %c0_10, %c0_11] : memref<1x64x1xf32, #tpu.memory_space<vmem>>, vector<1x64x1xf32>
    %19 = vector.broadcast %7 : vector<1x1x1xf32> to vector<1x64x1xf32>
    %20 = arith.mulf %19, %17 : vector<1x64x1xf32>
    %21 = arith.subf %18, %20 : vector<1x64x1xf32>
    %22 = vector.broadcast %17 : vector<1x64x1xf32> to vector<1x64x256xf32>
    %23 = arith.mulf %0, %22 : vector<1x64x256xf32>
    %24 = vector.broadcast %21 : vector<1x64x1xf32> to vector<1x64x256xf32>
    %25 = arith.addf %23, %24 : vector<1x64x256xf32>
    %c0_12 = arith.constant 0 : index
    %c0_13 = arith.constant 0 : index
    %c0_14 = arith.constant 0 : index
    %26 = vector.load %arg4[%c0_12, %c0_13, %c0_14] : memref<1x64x256xf32, #tpu.memory_space<vmem>>, vector<1x64x256xf32>
    tpu.vector_store %arg4[%c0_12, %c0_13, %c0_14], %25 {strides = array<i32>} : memref<1x64x256xf32, #tpu.memory_space<vmem>>, vector<1x64x256xf32>,
    return
  }
  func.func @transform_0(%arg0: i32) -> (i32, i32, i32) {
    %c0_i32 = arith.constant 0 : i32
    %c0_i32_0 = arith.constant 0 : i32
    %c0_i32_1 = arith.constant 0 : i32
    return %arg0, %c0_i32, %c0_i32_0 : i32, i32, i32
  }
  func.func @transform_1(%arg0: i32) -> (i32, i32, i32) {
    %c0_i32 = arith.constant 0 : i32
    %c0_i32_0 = arith.constant 0 : i32
    %c0_i32_1 = arith.constant 0 : i32
    %c0_i32_2 = arith.constant 0 : i32
    return %c0_i32, %c0_i32_0, %c0_i32_1 : i32, i32, i32
  }
  func.func @transform_2(%arg0: i32) -> (i32, i32, i32) {
    %c0_i32 = arith.constant 0 : i32
    %c0_i32_0 = arith.constant 0 : i32
    %c0_i32_1 = arith.constant 0 : i32
    %c0_i32_2 = arith.constant 0 : i32
    return %c0_i32, %c0_i32_0, %c0_i32_1 : i32, i32, i32
  }
  func.func @transform_3(%arg0: i32) -> (i32, i32, i32) {
    %c0_i32 = arith.constant 0 : i32
    %c0_i32_0 = arith.constant 0 : i32
    %c0_i32_1 = arith.constant 0 : i32
    return %arg0, %c0_i32, %c0_i32_0 : i32, i32, i32
  }
}

</mosaic_0001>

<bundles_post_ra>
// kernel: layer_norm.1
= control target key start
LH: loop header
LB: loop body
LE: loop exit
PB: predicated region body
PF: predicated region fallthrough
CT: control target
= control target key end

     0   :  { %s533_s12 = smov 0   ;;  %s737_s0 = inlined_call_operand.vmem [shape: f32[2,64,256], index: 0, kind: input, shape index: {}]   ;;  %s738_s1 = inlined_call_operand.vmem [shape: f32[1,64,1], index: 1, kind: input, shape index: {}]   ;;  %s739_s2 = inlined_call_operand.vmem [shape: f32[1,64,1], index: 2, kind: input, shape index: {}]   ;;  %s740_s3 = inlined_call_operand.vmem [shape: f32[2,64,256], index: 3, kind: output, shape index: {}]  }
   0x1 LB: > { %s478_s13 = sadd.s32 4294967295, %s510_s12   ;;  %p482_p0 = scmp.ge.s32.totalorder %s510_s12, 1  ;;  %s510_s12 = sphi %s533_s12, %s13_s12  }
   0x2   : > { %p137_p1 = scmp.lt.s32.totalorder %s510_s12, 3 }
   0x4   : > { %p138_p2 = pnand %p482_p0, %p137_p1 }
   0x5   : > { %p161_p3 = scmp.lt.s32.totalorder (!%p138_p2), %s478_s13, 1  ;;  %v512_v62 = vmov (!%p138_p2), 0  }
   0x6   : > { %141 = sbr.rel (%p138_p2) target bundleno = 407 (0x197), region = 32  ;;  %501 = vset.pattern.permute.xlu0 (!%p138_p2), %v512_v62  ;;  %500 = vset.pattern.permute.xlu1 (!%p138_p2), %v512_v62 }
   0xd   : > { %s742_s13 = smov (!%p161_p3, %s478_s13), 1 }
   0xe   : > { %s489_s14 = sshll.u32 %s742_s13, 7 }
   0xf   : > { %s549_s17 = scalar_lea.vmem %s737_s0, %s489_s14  ;;  %s702_s28 = scalar_lea.vmem %s740_s3, %s489_s14 }
  0x10   : > { %v552_v0 = vld [vmem:[%s549_s17] sm:$0xff]  ;;  %v555_v1 = vld [vmem:[%s549_s17 + $0x8] sm:$0xff]  ;;  %v558_v2 = vld [vmem:[%s549_s17 + $0x10] sm:$0xff] }
  0x11   : > { %v187_v3 = vadd.f32 %v555_v1, %v552_v0  ;;  %v210_v4 = vmul.f32 %v552_v0, %v552_v0  ;;  %v211_v5 = vmul.f32 %v555_v1, %v555_v1  ;;  %v567_v6 = vld [vmem:[%s549_s17 + $0x18] sm:$0xff]  ;;  %v212_v7 = vmul.f32 %v558_v2, %v558_v2  ;;  %v573_v9 = vld [vmem:[%s549_s17 + $0x20] sm:$0xff]  ;;  %v579_v13 = vld [vmem:[%s549_s17 + $0x28] sm:$0xff] }
  0x12   : > { %v213_v10 = vmul.f32 %v567_v6, %v567_v6  ;;  %v214_v14 = vmul.f32 %v573_v9, %v573_v9  ;;  %v585_v17 = vld [vmem:[%s549_s17 + $0x30] sm:$0xff]  ;;  %v215_v18 = vmul.f32 %v579_v13, %v579_v13  ;;  %v591_v21 = vld [vmem:[%s549_s17 + $0x38] sm:$0xff]  ;;  %v597_v25 = vld [vmem:[%s549_s17 + $0x40] sm:$0xff] }
  0x13   : > { %v188_v8 = vadd.f32 %v187_v3, %v558_v2  ;;  %v226_v11 = vadd.f32 %v211_v5, %v210_v4  ;;  %v216_v22 = vmul.f32 %v585_v17, %v585_v17  ;;  %v217_v26 = vmul.f32 %v591_v21, %v591_v21  ;;  %v603_v29 = vld [vmem:[%s549_s17 + $0x48] sm:$0xff]  ;;  %v609_v33 = vld [vmem:[%s549_s17 + $0x50] sm:$0xff]  ;;  %v615_v37 = vld [vmem:[%s549_s17 + $0x58] sm:$0xff] }
  0x14   : > { %v218_v30 = vmul.f32 %v597_v25, %v597_v25  ;;  %v219_v34 = vmul.f32 %v603_v29, %v603_v29  ;;  %v220_v38 = vmul.f32 %v609_v33, %v609_v33  ;;  %v621_v41 = vld [vmem:[%s549_s17 + $0x60] sm:$0xff]  ;;  %v221_v42 = vmul.f32 %v615_v37, %v615_v37  ;;  %v627_v45 = vld [vmem:[%s549_s17 + $0x68] sm:$0xff]  ;;  %v633_v49 = vld [vmem:[%s549_s17 + $0x70] sm:$0xff] }
  0x15   : > { %v189_v12 = vadd.f32 %v188_v8, %v567_v6  ;;  %v227_v15 = vadd.f32 %v226_v11, %v212_v7  ;;  %v222_v46 = vmul.f32 %v621_v41, %v621_v41  ;;  %v223_v50 = vmul.f32 %v627_v45, %v627_v45  ;;  %v639_v53 = vld [vmem:[%s549_s17 + $0x78] sm:$0xff] }
  0x16   : > { %v224_v54 = vmul.f32 %v633_v49, %v633_v49  ;;  %v225_v57 = vmul.f32 %v639_v53, %v639_v53 }
  0x17   : > { %v190_v16 = vadd.f32 %v189_v12, %v573_v9  ;;  %v228_v19 = vadd.f32 %v227_v15, %v213_v10 }
  0x19   : > { %v191_v20 = vadd.f32 %v190_v16, %v579_v13  ;;  %v229_v23 = vadd.f32 %v228_v19, %v214_v14 }
  0x1b   : > { %v192_v24 = vadd.f32 %v191_v20, %v585_v17  ;;  %v230_v27 = vadd.f32 %v229_v23, %v215_v18 }
  0x1d   : > { %v193_v28 = vadd.f32 %v192_v24, %v591_v21  ;;  %v231_v31 = vadd.f32 %v230_v27, %v216_v22  ;;  %v257_v27 = vld [vmem:[%s738_s1 + $0x10] sm:$0xff] }
  0x1f   : > { %v194_v32 = vadd.f32 %v193_v28, %v597_v25  ;;  %v232_v35 = vadd.f32 %v231_v31, %v217_v26  ;;  %v255_v28 = vld [vmem:[%s738_s1] sm:$0xff] }
  0x21   : > { %v195_v36 = vadd.f32 %v194_v32, %v603_v29  ;;  %v233_v39 = vadd.f32 %v232_v35, %v218_v30  ;;  %v261_v30 = vld [vmem:[%s738_s1 + $0x30] sm:$0xff] }
  0x23   : > { %v196_v40 = vadd.f32 %v195_v36, %v609_v33  ;;  %v234_v43 = vadd.f32 %v233_v39, %v219_v34  ;;  %v277_v36 = vld [vmem:[%s739_s2 + $0x30] sm:$0xff] }
  0x25   : > { %v197_v44 = vadd.f32 %v196_v40, %v615_v37  ;;  %v235_v47 = vadd.f32 %v234_v43, %v220_v38  ;;  %v256_v38 = vld [vmem:[%s738_s1 + $0x8] sm:$0xff]  ;;  %v258_v43 = vld [vmem:[%s738_s1 + $0x18] sm:$0xff] }
  0x27   : > { %v198_v48 = vadd.f32 %v197_v44, %v621_v41  ;;  %v236_v51 = vadd.f32 %v235_v47, %v221_v42 }
  0x29   : > { %v199_v52 = vadd.f32 %v198_v48, %v627_v45  ;;  %v237_v55 = vadd.f32 %v236_v51, %v222_v46  ;;  %v259_v46 = vld [vmem:[%s738_s1 + $0x20] sm:$0xff]  ;;  %v260_v48 = vld [vmem:[%s738_s1 + $0x28] sm:$0xff]  ;;  %v262_v51 = vld [vmem:[%s738_s1 + $0x38] sm:$0xff] }
  0x2b   : > { %v200_v56 = vadd.f32 %v199_v52, %v633_v49  ;;  %v238_v58 = vadd.f32 %v237_v55, %v223_v50  ;;  %v271_v55 = vld [vmem:[%s739_s2] sm:$0xff] }
  0x2d   : > { %v201_v59 = vadd.f32 %v200_v56, %v639_v53  ;;  %v239_v60 = vadd.f32 %v238_v58, %v224_v54  ;;  %v272_v58 = vld [vmem:[%s739_s2 + $0x8] sm:$0xff] }
  0x2f   : > { %202 = vadd.xlane.f32.xlu0 %v201_v59  ;;  %v240_v61 = vadd.f32 %v239_v60, %v225_v57 }
  0x33   : > { %241 = vadd.xlane.f32.xlu0 %v240_v61  ;;  %v273_v61 = vld [vmem:[%s739_s2 + $0x10] sm:$0xff] }
  0xbc   : > { %v203_v63 = vpop.xlane.xlu0 %202 }
  0xbd   : > { %v204_v3 = vrot.slane %v203_v63, 4 }
  0xbf   : > { %v205_v4 = vadd.f32 %v204_v3, %v203_v63  ;;  %v274_v3 = vld [vmem:[%s739_s2 + $0x18] sm:$0xff] }
  0xc0   : > { %v242_v5 = vpop.xlane.xlu0 %241 }
  0xc1   : > { %v206_v7 = vrot.slane %v205_v4, 2  ;;  %v243_v8 = vrot.slane %v242_v5, 4 }
  0xc3   : > { %v207_v10 = vadd.f32 %v206_v7, %v205_v4  ;;  %v244_v11 = vadd.f32 %v243_v8, %v242_v5  ;;  %v275_v7 = vld [vmem:[%s739_s2 + $0x20] sm:$0xff] }
  0xc5   : > { %v208_v12 = vrot.slane %v207_v10, 1  ;;  %v245_v14 = vrot.slane %v244_v11, 2 }
  0xc7   : > { %v209_v15 = vadd.f32 %v208_v12, %v207_v10  ;;  %v246_v16 = vadd.f32 %v245_v14, %v244_v11  ;;  %v276_v11 = vld [vmem:[%s739_s2 + $0x28] sm:$0xff] }
  0xc9   : > { %v249_v18 = vmul.f32 6.1035156e-05, %v209_v15  ;;  %v247_v19 = vrot.slane %v246_v16, 1  ;;  %v278_v15 = vld [vmem:[%s739_s2 + $0x38] sm:$0xff] }
  0xcb   : > { %v248_v20 = vadd.f32 %v247_v19, %v246_v16  ;;  %v251_v22 = vmul.f32 %v249_v18, %v249_v18 }
  0xcd   : > { %v250_v23 = vmul.f32 6.1035156e-05, %v248_v20 }
  0xcf   : > { %v252_v24 = vsub.f32 %v250_v23, %v251_v22 }
  0xd1   : > { %v253_v26 = vadd.f32 1e-05, %v252_v24 }
  0xd3   : > { %502 = vrsqrt.f32 %v253_v26 }
  0xdd   : > { %v503_v31 = vpop.eup %502 }
  0xde   : > { %v265_v32 = vmul.f32 %v503_v31, %v257_v27  ;;  %v263_v34 = vmul.f32 %v503_v31, %v255_v28  ;;  %v269_v35 = vmul.f32 %v503_v31, %v261_v30  ;;  %v264_v42 = vmul.f32 %v503_v31, %v256_v38 }
  0xdf   : > { %v266_v44 = vmul.f32 %v503_v31, %v258_v43  ;;  %v267_v47 = vmul.f32 %v503_v31, %v259_v46  ;;  %v268_v50 = vmul.f32 %v503_v31, %v260_v48  ;;  %v270_v54 = vmul.f32 %v503_v31, %v262_v51 }
  0xe0   : > { %307 = vperm.xlu0 %501, %v265_v32   ;;  %297 = vperm.xlu1 %500, %v263_v34   ;;  %v285_v39 = vmul.f32 %v269_v35, %v249_v18  ;;  %v279_v52 = vmul.f32 %v263_v34, %v249_v18  ;;  %v280_v57 = vmul.f32 %v264_v42, %v249_v18 }
  0xe1   : > { %v281_v60 = vmul.f32 %v265_v32, %v249_v18  ;;  %v282_v63 = vmul.f32 %v266_v44, %v249_v18  ;;  %v283_v5 = vmul.f32 %v267_v47, %v249_v18  ;;  %v284_v10 = vmul.f32 %v268_v50, %v249_v18 }
  0xe2   : > { %v293_v40 = vsub.f32 %v277_v36, %v285_v39  ;;  %v287_v56 = vsub.f32 %v271_v55, %v279_v52  ;;  %v288_v59 = vsub.f32 %v272_v58, %v280_v57  ;;  %v286_v14 = vmul.f32 %v270_v54, %v249_v18 }
  0xe3   : > { %v289_v62 = vsub.f32 %v273_v61, %v281_v60  ;;  %v290_v4 = vsub.f32 %v274_v3, %v282_v63  ;;  %v291_v8 = vsub.f32 %v275_v7, %v283_v5  ;;  %v292_v12 = vsub.f32 %v276_v11, %v284_v10 }
  0xe4   : > { %383 = vperm.xlu0 %501, %v293_v40   ;;  %302 = vperm.xlu1 %500, %v264_v42   ;;  %v294_v16 = vsub.f32 %v278_v15, %v286_v14 }
  0xe8   : > { %312 = vperm.xlu1 %500, %v266_v44  }
  0xec   : > { %317 = vperm.xlu1 %500, %v267_v47  }
  0xf0   : > { %322 = vperm.xlu1 %500, %v268_v50  }
  0xf4   : > { %327 = vperm.xlu1 %500, %v269_v35  }
  0xf8   : > { %332 = vperm.xlu1 %500, %v270_v54  }
  0xfc   : > { %353 = vperm.xlu1 %500, %v287_v56  }
 0x100   : > { %358 = vperm.xlu1 %500, %v288_v59  }
 0x104   : > { %363 = vperm.xlu1 %500, %v289_v62  }
 0x108   : > { %368 = vperm.xlu1 %500, %v290_v4  }
 0x10c   : > { %373 = vperm.xlu1 %500, %v291_v8  }
 0x110   : > { %378 = vperm.xlu1 %500, %v292_v12  }
 0x114   : > { %388 = vperm.xlu1 %500, %v294_v16  }
 0x15f   : > { %v298_v19 = vpop.permute.xlu1 %297  ;;  %v308_v24 = vpop.permute.xlu0 %307 }
 0x160   : > { %v339_v46 = vmul.f32 %v308_v24, %v573_v9 }
 0x163   : > { %v303_v20 = vpop.permute.xlu1 %302  ;;  %v384_v31 = vpop.permute.xlu0 %383 }
 0x164   : > { %v337_v39 = vmul.f32 %v303_v20, %v558_v2  ;;  %v338_v40 = vmul.f32 %v303_v20, %v567_v6 }
 0x167   : > { %v313_v22 = vpop.permute.xlu1 %312 }
 0x168   : > { %v341_v48 = vmul.f32 %v313_v22, %v585_v17  ;;  %v342_v6 = vmul.f32 %v313_v22, %v591_v21 }
 0x16b   : > { %v318_v23 = vpop.permute.xlu1 %317 }
 0x16c   : > { %v343_v52 = vmul.f32 %v318_v23, %v597_v25 }
 0x16f   : > { %v323_v26 = vpop.permute.xlu1 %322 }
 0x170   : > { %v345_v21 = vmul.f32 %v323_v26, %v609_v33  ;;  %v346_v56 = vmul.f32 %v323_v26, %v615_v37 }
 0x173   : > { %v328_v27 = vpop.permute.xlu1 %327 }
 0x174   : > { %v347_v28 = vmul.f32 %v328_v27, %v621_v41  ;;  %v348_v30 = vmul.f32 %v328_v27, %v627_v45  ;;  %v335_v41 = vmul.f32 %v298_v19, %v552_v0  ;;  %v336_v45 = vmul.f32 %v298_v19, %v555_v1 }
 0x175   : > { %v340_v0 = vmul.f32 %v308_v24, %v579_v13  ;;  %v344_v13 = vmul.f32 %v318_v23, %v603_v29 }
 0x176   : > { %v403_v18 = vadd.f32 %v384_v31, %v347_v28  ;;  %v404_v32 = vadd.f32 %v384_v31, %v348_v30 }
 0x177   : > { %v333_v34 = vpop.permute.xlu1 %332 }
 0x178   : > { %419 = vst [vmem:[%s702_s28 + $0x60] sm:$0xff] %v403_v18  ;;  %420 = vst [vmem:[%s702_s28 + $0x68] sm:$0xff] %v404_v32  ;;  %v349_v59 = vmul.f32 %v333_v34, %v633_v49  ;;  %v350_v29 = vmul.f32 %v333_v34, %v639_v53 }
 0x17b   : > { %v354_v35 = vpop.permute.xlu1 %353 }
 0x17c   : > { %v391_v36 = vadd.f32 %v354_v35, %v335_v41  ;;  %v392_v38 = vadd.f32 %v354_v35, %v336_v45 }
 0x17e   : > { %407 = vst [vmem:[%s702_s28] sm:$0xff] %v391_v36  ;;  %408 = vst [vmem:[%s702_s28 + $0x8] sm:$0xff] %v392_v38 }
 0x17f   : > { %v359_v42 = vpop.permute.xlu1 %358 }
 0x180   : > { %v393_v43 = vadd.f32 %v359_v42, %v337_v39  ;;  %v394_v44 = vadd.f32 %v359_v42, %v338_v40 }
 0x182   : > { %409 = vst [vmem:[%s702_s28 + $0x10] sm:$0xff] %v393_v43  ;;  %410 = vst [vmem:[%s702_s28 + $0x18] sm:$0xff] %v394_v44 }
 0x183   : > { %v364_v1 = vpop.permute.xlu1 %363 }
 0x184   : > { %v395_v47 = vadd.f32 %v364_v1, %v339_v46  ;;  %v396_v2 = vadd.f32 %v364_v1, %v340_v0 }
 0x186   : > { %411 = vst [vmem:[%s702_s28 + $0x20] sm:$0xff] %v395_v47  ;;  %412 = vst [vmem:[%s702_s28 + $0x28] sm:$0xff] %v396_v2 }
 0x187   : > { %v369_v50 = vpop.permute.xlu1 %368 }
 0x188   : > { %v397_v51 = vadd.f32 %v369_v50, %v341_v48  ;;  %v398_v9 = vadd.f32 %v369_v50, %v342_v6 }
 0x18a   : > { %413 = vst [vmem:[%s702_s28 + $0x30] sm:$0xff] %v397_v51  ;;  %414 = vst [vmem:[%s702_s28 + $0x38] sm:$0xff] %v398_v9 }
 0x18b   : > { %v374_v54 = vpop.permute.xlu1 %373 }
 0x18c   : > { %v399_v55 = vadd.f32 %v374_v54, %v343_v52  ;;  %v400_v17 = vadd.f32 %v374_v54, %v344_v13 }
 0x18e   : > { %415 = vst [vmem:[%s702_s28 + $0x40] sm:$0xff] %v399_v55  ;;  %416 = vst [vmem:[%s702_s28 + $0x48] sm:$0xff] %v400_v17 }
 0x18f   : > { %v379_v57 = vpop.permute.xlu1 %378 }
 0x190   : > { %v401_v58 = vadd.f32 %v379_v57, %v345_v21  ;;  %v402_v25 = vadd.f32 %v379_v57, %v346_v56 }
 0x192   : > { %417 = vst [vmem:[%s702_s28 + $0x50] sm:$0xff] %v401_v58  ;;  %418 = vst [vmem:[%s702_s28 + $0x58] sm:$0xff] %v402_v25 }
 0x193   : > { %v389_v60 = vpop.permute.xlu1 %388 }
 0x194   : > { %v405_v61 = vadd.f32 %v389_v60, %v349_v59  ;;  %v406_v62 = vadd.f32 %v389_v60, %v350_v29 }
 0x196   : > { %421 = vst [vmem:[%s702_s28 + $0x70] sm:$0xff] %v405_v61  ;;  %422 = vst [vmem:[%s702_s28 + $0x78] sm:$0xff] %v406_v62 }
 0x197 PF: > { %s13_s12 = sadd.s32 1, %s510_s12  }
 0x198   : > { %p10_p4 = scmp.ge.s32.totalorder %s13_s12, 4  }
 0x19a   :  { %12 = sbr.rel (!%p10_p4) target bundleno = 1 (0x1), region = 62 }

</bundles_post_ra>
